<compile_context>
chip_gen: v7x
topology: tpu7x:2x2x1
jax: 0.10.0
libtpu: 0.0.40
codegen_flags: <defaults>
</compile_context>

<pallas_src>
import functools

import jax
import jax.numpy as jnp
from jax import lax
from jax.experimental import pallas as pl
from jax.experimental.pallas import tpu as pltpu


_MIB = 1024 * 1024


def _row_align(dtype):
    # Second-to-last block-dim alignment (sublane packing by element width).
    itemsize = jnp.dtype(dtype).itemsize
    return {4: 8, 2: 16, 1: 32}.get(itemsize, 8)


def _vmem_capacity_bytes():
    try:
        return int(pltpu.get_tpu_info().vmem_capacity_bytes)
    except Exception:
        return 64 * _MIB  # conservative (v7x-like) fallback


def _round_up(x, m):
    return ((x + m - 1) // m) * m


def _choose_tiles(rows, hw, dtype, budget):
    """Returns (tr, hw_tile). hw_tile == hw means the reduction axis is NOT tiled."""
    itemsize = jnp.dtype(dtype).itemsize
    align = _row_align(dtype)

    # Tile the reduction (hw) axis only when even a minimal row tile over the
    # full spatial extent would blow the per-tile budget. hw_tile is a large,
    # burst-friendly multiple of 128; raggedness is handled by an in-kernel
    # lane mask, so hw needs no divisibility property.
    if align * hw * itemsize > budget:
        hw_tile = max(128, (budget // (align * itemsize)) // 128 * 128)
        tr = rows if rows <= align else align
        return tr, hw_tile

    # Full spatial extent per step: make the row tile as big as the budget
    # allows, but keep at least two row tiles when rows permit so the
    # 'parallel' row axis can shard across v7x's two TensorCores (and simply
    # pipelines two halves on 1-TC chips).
    max_tr = max(align, (budget // (hw * itemsize)) // align * align)
    if rows >= 2 * align:
        max_tr = min(max_tr, _round_up(pl.cdiv(rows, 2), align))
    tr = rows if rows <= max_tr else max_tr
    return tr, hw


def _gap_full_kernel(x_ref, o_ref, *, inv_hw):
    # Whole spatial extent in one tile: no accumulator, no predication.
    o_ref[...] = (
        jnp.sum(x_ref[...], axis=-1, dtype=jnp.float32, keepdims=True) * inv_hw
    ).astype(o_ref.dtype)


def _gap_tiled_kernel(x_ref, o_ref, acc_ref, *, inv_hw, hw, hw_tile, ragged):
    # Grid = (row_tiles, hw_tiles); reduction (hw) axis last, f32 resident acc.
    k = pl.program_id(1)
    last = pl.num_programs(1) - 1

    @pl.when(k == 0)
    def _():
        acc_ref[...] = jnp.zeros_like(acc_ref)

    if ragged:
        # Only the final hw tile hangs off the array edge; mask only there so
        # the hot steps stay pure load+add.
        @pl.when(k != last)
        def _():
            acc_ref[...] += jnp.sum(
                x_ref[...], axis=-1, dtype=jnp.float32, keepdims=True)

        @pl.when(k == last)
        def _():
            x = x_ref[...]
            pos = k * hw_tile + lax.broadcasted_iota(jnp.int32, (1, hw_tile), 1)
            x = jnp.where(pos < hw, x, 0)
            acc_ref[...] += jnp.sum(x, axis=-1, dtype=jnp.float32, keepdims=True)
    else:
        acc_ref[...] += jnp.sum(
            x_ref[...], axis=-1, dtype=jnp.float32, keepdims=True)

    @pl.when(k == last)
    def _():
        o_ref[...] = (acc_ref[...] * inv_hw).astype(o_ref.dtype)


def global_avg_pool2d(x, *, tile_budget_bytes=None):
    """Pallas equivalent of F.avg_pool2d(x, kernel_size=x.size()[2:]) for NCHW."""
    n, c, h, w = x.shape
    rows, hw = n * c, h * w
    x2d = x.reshape(rows, hw)
    itemsize = jnp.dtype(x.dtype).itemsize

    cap = _vmem_capacity_bytes()
    budget = (tile_budget_bytes if tile_budget_bytes is not None
              else min(16 * _MIB, cap // 5))

    tr, hw_tile = _choose_tiles(rows, hw, x.dtype, budget)
    inv_hw = 1.0 / hw

    cost = pl.CostEstimate(
        flops=rows * hw,
        transcendentals=0,
        bytes_accessed=rows * hw * itemsize + rows * itemsize,
    )

    if hw_tile == hw:
        # Common case: full spatial extent per step.
        grid = (pl.cdiv(rows, tr),)
        n_bufs = 2
        kernel = functools.partial(_gap_full_kernel, inv_hw=inv_hw)
        in_specs = [pl.BlockSpec((tr, hw), lambda i: (i, 0))]
        out_specs = pl.BlockSpec((tr, 1), lambda i: (i, 0))
        scratch_shapes = []
        dim_sem = ("parallel",)
    else:
        # Huge spatial extent: tile the reduction axis (last grid axis).
        grid = (pl.cdiv(rows, tr), pl.cdiv(hw, hw_tile))
        n_bufs = 3  # deepen input pipelining: hw blocks are strided on HBM
        ragged = (hw % hw_tile) != 0
        kernel = functools.partial(
            _gap_tiled_kernel, inv_hw=inv_hw, hw=hw, hw_tile=hw_tile, ragged=ragged)
        in_specs = [pl.BlockSpec((tr, hw_tile), lambda i, k: (i, k),
                                 pipeline_mode=pl.Buffered(n_bufs))]
        out_specs = pl.BlockSpec((tr, 1), lambda i, k: (i, 0))
        scratch_shapes = [pltpu.VMEM((tr, 1), jnp.float32)]
        dim_sem = ("parallel", "arbitrary")

    # Explicit scoped-VMEM limit: cover all input buffers + (double-buffered)
    # output + scratch + slack, never lower than the default-ish 32 MiB, and
    # stay well under the physical capacity of this generation.
    tile_bytes = tr * hw_tile * itemsize
    need = n_bufs * tile_bytes + 2 * tr * itemsize + tr * 4 + 2 * _MIB
    vmem_limit = min(max(need, 32 * _MIB), cap * 3 // 4)
    vmem_limit = int(max(vmem_limit, need))

    out2d = pl.pallas_call(
        kernel,
        out_shape=jax.ShapeDtypeStruct((rows, 1), x.dtype),
        grid_spec=pltpu.PrefetchScalarGridSpec(
            num_scalar_prefetch=0,
            grid=grid,
            in_specs=in_specs,
            out_specs=out_specs,
            scratch_shapes=scratch_shapes,
        ),
        compiler_params=pltpu.CompilerParams(
            dimension_semantics=dim_sem,
            vmem_limit_bytes=vmem_limit,
        ),
        cost_estimate=cost,
    )(x2d)

    return out2d.reshape(n, c, 1, 1)


if __name__ == "__main__":
    key = jax.random.PRNGKey(0)

    # Small NCHW input consistent with the module's forward.
    x = jax.random.normal(key, (2, 4, 16, 16), dtype=jnp.float32)
    out = jax.block_until_ready(global_avg_pool2d(x))
    ref = jnp.mean(x, axis=(2, 3), keepdims=True)
    assert out.shape == (2, 4, 1, 1), out.shape
    assert jnp.allclose(out, ref, atol=1e-5, rtol=1e-5), "mismatch vs reference"

    # Many rows: exercises >=2 row tiles (megacore split) and a ragged final row tile.
    x2 = jax.random.normal(jax.random.PRNGKey(1), (8, 125, 32, 32), dtype=jnp.float32)
    out2 = jax.block_until_ready(global_avg_pool2d(x2))
    ref2 = jnp.mean(x2, axis=(2, 3), keepdims=True)
    assert jnp.allclose(out2, ref2, atol=1e-5, rtol=1e-5), "mismatch (row-tiled)"

    # bf16 input: exercises 16-row sublane alignment and the 2-way row split.
    x3 = jax.random.normal(jax.random.PRNGKey(2), (2, 16, 16, 16), dtype=jnp.bfloat16)
    out3 = jax.block_until_ready(global_avg_pool2d(x3))
    ref3 = jnp.mean(x3.astype(jnp.float32), axis=(2, 3), keepdims=True).astype(jnp.bfloat16)
    assert jnp.allclose(out3.astype(jnp.float32), ref3.astype(jnp.float32),
                        atol=1e-2, rtol=1e-2), "mismatch (bf16)"

    # Reduction-axis (hw) tiling, evenly divisible (forced small budget for testing).
    x4 = jax.random.normal(jax.random.PRNGKey(3), (1, 4, 128, 128), dtype=jnp.float32)
    out4 = jax.block_until_ready(global_avg_pool2d(x4, tile_budget_bytes=256 * 1024))
    ref4 = jnp.mean(x4, axis=(2, 3), keepdims=True)
    assert jnp.allclose(out4, ref4, atol=1e-5, rtol=1e-5), "mismatch (hw-tiled)"

    # Reduction-axis tiling with a ragged (non multiple-of-128) spatial extent:
    # exercises the in-kernel lane mask.
    x5 = jax.random.normal(jax.random.PRNGKey(4), (2, 3, 100, 100), dtype=jnp.float32)
    out5 = jax.block_until_ready(global_avg_pool2d(x5, tile_budget_bytes=128 * 1024))
    ref5 = jnp.mean(x5, axis=(2, 3), keepdims=True)
    assert jnp.allclose(out5, ref5, atol=1e-5, rtol=1e-5), "mismatch (hw-tiled ragged)"

    print("KERNEL_OK")
</pallas_src>

<mosaic_0001>
module attributes {stable_mosaic.version = 11 : i64} {
  func.func @_gap_full_kernel(%arg0: i32, %arg1: memref<8x256xf32, #tpu.memory_space<vmem>>, %arg2: memref<8x1xf32, #tpu.memory_space<vmem>>) attributes {dimension_semantics = [#tpu.dimension_semantics<parallel>], iteration_bounds = array<i64: 1>, scalar_prefetch = 0 : i64, scratch_operands = 0 : i64, tpu.core_type = #tpu.core_type<tc>, window_params = [{transform_indices = @transform_0, window_bounds = array<i64: 8, 256>}, {transform_indices = @transform_1, window_bounds = array<i64: 8, 1>}]} {
    %c0 = arith.constant 0 : index
    %c0_0 = arith.constant 0 : index
    %0 = vector.load %arg1[%c0, %c0_0] : memref<8x256xf32, #tpu.memory_space<vmem>>, vector<8x256xf32>
    %cst = arith.constant dense<0.000000e+00> : vector<8xf32>
    %1 = vector.multi_reduction <add>, %0, %cst [1] : vector<8x256xf32> to vector<8xf32>
    %2 = vector.shape_cast %1 : vector<8xf32> to vector<8x1xf32>
    %cst_1 = arith.constant 3.906250e-03 : f32
    %3 = vector.broadcast %cst_1 : f32 to vector<8x1xf32>
    %4 = arith.mulf %2, %3 : vector<8x1xf32>
    %c0_2 = arith.constant 0 : index
    %c0_3 = arith.constant 0 : index
    %5 = vector.load %arg2[%c0_2, %c0_3] : memref<8x1xf32, #tpu.memory_space<vmem>>, vector<8x1xf32>
    tpu.vector_store %arg2[%c0_2, %c0_3], %4 {strides = array<i32>} : memref<8x1xf32, #tpu.memory_space<vmem>>, vector<8x1xf32>,
    return
  }
  func.func @transform_0(%arg0: i32) -> (i32, i32) {
    %c0_i32 = arith.constant 0 : i32
    %c0_i32_0 = arith.constant 0 : i32
    return %arg0, %c0_i32 : i32, i32
  }
  func.func @transform_1(%arg0: i32) -> (i32, i32) {
    %c0_i32 = arith.constant 0 : i32
    %c0_i32_0 = arith.constant 0 : i32
    return %arg0, %c0_i32 : i32, i32
  }
}

</mosaic_0001>

<bundles_post_ra>
// kernel: tpu_custom_call.1
= control target key start
LH: loop header
LB: loop body
LE: loop exit
PB: predicated region body
PF: predicated region fallthrough
CT: control target
= control target key end

     0   :  { %6 = vsyncpa [#allocation3], 0  ;;  %s58_s6 = smov [#allocation2]   ;;  %s84_s0 = inlined_call_operand.hbm [shape: f32[8,256], index: 0, kind: input, shape index: {}]   ;;  %s85_s1 = inlined_call_operand.vmem [shape: f32[8,1], index: 1, kind: output, shape index: {}]  }
   0x1   :  { %s13_s7 = sshll.u32 %s58_s6, 4  ;;  %s34_s10 = scalar_lea.hbm %s84_s0, 256  ;;  %s14_s7 = int_to_ptr.vmem [resolvable:$true] %s13_s7 }
   0x2   :  { %p35_p0 = scmp.ne.s32.totalorder %s84_s0, %s34_s10  ;;  %p38_p1 = scmp.lt.u32.totalorder %s34_s10, %s84_s0 }
   0x4   :  { %p40_p2 = pnand %p38_p1, %p35_p0 }
   0x6   :  { %43 = shalt.err (!%p40_p2)
}
   0x7   :  { %s44_s15 = scalar_lea.vmem %s14_s7, 256  ;;  %p49_p4 = scmp.lt.s32.totalorder %s14_s7, %s14_s7 }
   0x8   :  { %p45_p3 = scmp.ne.s32.totalorder %s14_s7, %s44_s15  ;;  %p50_p5 = scmp.lt.s32.totalorder %s44_s15, %s44_s15 }
   0xa   :  { %p51_p6 = por %p50_p5, %p49_p4 }
   0xc   :  { %p52_p7 = pnand %p51_p6, %p45_p3 }
   0xe   :  { %55 = shalt.err (!%p52_p7)
}
   0xf   :  { %16 = dma.hbm_to_vmem [thread:$0]  %s84_s0, 256, %s14_s7, [#allocation3]  }
  0x10   :  { %56 = dma.done.wait [#allocation3], 256  }
  0x11   :  { %57 = vsyncadd [#allocation3], 4294967040  ;;  %v20_v0 = vld [vmem:[#allocation2] sm:$0xff]  ;;  %v21_v1 = vld [vmem:[#allocation2 + $0x8] sm:$0xff]  ;;  %vm26_vm0 = vcmask 7168  }
  0x12   :  { %v22_v2 = vadd.f32 %v21_v1, %v20_v0 }
  0x14   :  { %23 = vadd.xlane.f32.xlu0 %v22_v2 }
  0xa1   :  { %v24_v3 = vpop.xlane.xlu0 %23 }
  0xa2   :  { %v25_v4 = vmul.f32 0.00390625, %v24_v3 }
  0xa4   :  { %27 = vst.msk [vmem:[%s85_s1] sm:$0xff] %vm26_vm0, %v25_v4 }
  0xa5   :  { %32 = vsyncpa [#allocation3], 1 }

</bundles_post_ra>
